<compile_context>
chip_gen: v6e
topology: v6e:2x2x1
jax: 0.10.0
libtpu: 0.0.40
codegen_flags: <defaults>
</compile_context>

<pallas_src>
import math

import jax
import jax.numpy as jnp
from jax.experimental import pallas as pl
from jax.experimental.pallas import tpu as pltpu


def sap_kernel(x_ref, w1_ref, w2_ref, out_ref):
    # x_ref:  (TB, S, E)   TB batch elements' sequences
    # w1_ref: (E, A)       Linear(E, A, bias=False), input-major
    # w2_ref: (1, A)       Linear(A, 1, bias=False) as a lane-dense row
    # out_ref:(TB, E)      pooled embeddings (sublane/lane dense)
    TB, S, E = x_ref.shape
    x = x_ref[...]                                            # storage dtype

    # attention scores: tanh((TB*S, E) @ (E, A)) on the MXU, f32 accumulate
    scores = jnp.tanh(
        jnp.dot(x.reshape(TB * S, E), w1_ref[...],
                preferred_element_type=jnp.float32))          # (TB*S, A) f32

    # logits: contract the tiny A axis as a lane reduce -> (TB, S, 1) f32
    logits = jnp.sum(scores * w2_ref[...], axis=-1,
                     keepdims=True).reshape(TB, S, 1)

    # numerically-stable softmax over the sequence axis (torch dim=1), f32
    m = jnp.max(logits, axis=1, keepdims=True)                # (TB, 1, 1)
    e = jnp.exp(logits - m)
    denom = jnp.sum(e, axis=1, keepdims=True)                 # (TB, 1, 1)
    attn = e * pl.reciprocal(denom, approx=True)              # (TB, S, 1)

    # weighted pooling over the sequence, f32 accumulation -> (TB, E)
    pooled = jnp.sum(x.astype(jnp.float32) * attn, axis=1)
    out_ref[...] = pooled.astype(out_ref.dtype)


def _pick_batch_block(B, S, E, itemsize, target_bytes=2 << 20):
    """Pick TB: MiB-scale x tiles, TB % 8 == 0 (or TB == B for tiny batches)."""
    if B <= 8:
        return B                       # block == full batch dim (valid layout)
    tb = (target_bytes // (S * E * itemsize)) // 8 * 8
    tb = int(min(max(tb, 8), (B // 8) * 8))
    # keep >= 2 grid steps so v7x's two TensorCores both get work
    if tb >= B and B >= 16:
        tb = max(8, (B // 2) // 8 * 8)
    return tb


def self_attention_pooling(x, w1, w2, *, batch_block=None):
    """x: (B, S, E); w1: (E, A); w2: (A, 1) / (1, A) / (A,). Returns (B, E).

    Pass bf16 x/w1/w2 to halve HBM traffic; accumulation stays f32 in-kernel.
    """
    B, S, E = x.shape
    A = w1.shape[1]
    assert w1.shape == (E, A), w1.shape
    # NOTE: w2 is a length-A vector; (A,1), (1,A) and (A,) are all accepted.
    w1 = w1.astype(x.dtype)
    w2_row = jnp.reshape(w2, (1, A)).astype(x.dtype)

    itemsize = x.dtype.itemsize
    TB = batch_block if batch_block is not None else _pick_batch_block(
        B, S, E, itemsize)
    grid = (pl.cdiv(B, TB),)

    # VMEM budget: double-buffered x tile + output tile + resident weights
    # + headroom; clamp below v7x's 64 MiB physical per-TC VMEM.
    x_tile = TB * S * E * itemsize
    out_tile = TB * E * itemsize
    w_bytes = (E * A + A) * itemsize
    vmem_limit = int(min(max(2 * (x_tile + out_tile) + 2 * w_bytes + (8 << 20),
                             32 << 20), 56 << 20))

    cost = pl.CostEstimate(
        flops=2 * B * S * E * A + 2 * B * S * A + 3 * B * S * E,
        transcendentals=B * S * (A + 1),
        bytes_accessed=(B * S * E + B * E + E * A + A) * itemsize)

    return pl.pallas_call(
        sap_kernel,
        out_shape=jax.ShapeDtypeStruct((B, E), x.dtype),
        grid=grid,
        in_specs=[
            # TB batch elements per step -> MiB-scale, double-buffered DMAs
            pl.BlockSpec((TB, S, E), lambda b: (b, 0, 0)),
            # weights: constant index_map -> fetched once, VMEM-resident
            pl.BlockSpec((E, A), lambda b: (0, 0)),
            pl.BlockSpec((1, A), lambda b: (0, 0)),
        ],
        # lane- and sublane-dense output block -> unmasked full-tile stores
        out_specs=pl.BlockSpec((TB, E), lambda b: (b, 0)),
        compiler_params=pltpu.CompilerParams(
            dimension_semantics=("parallel",),
            vmem_limit_bytes=vmem_limit),
        cost_estimate=cost,
    )(x, w1, w2_row)


# ---------------- plain-JAX reference (for correctness check) ----------------


def reference_forward(x, w1, w2):
    scores = jnp.tanh(jnp.einsum("bse,ea->bsa", x, w1, precision="highest"))
    logits = jnp.einsum("bsa,ao->bso", scores, jnp.reshape(w2, (-1, 1)),
                        precision="highest")
    weights = jax.nn.softmax(logits, axis=1)                  # over sequence
    return jnp.sum(x * weights, axis=1)                       # (B, E)


if __name__ == "__main__":
    # small shapes consistent with the module's (batch, seq, embedding) input
    B, S, E, A = 2, 8, 32, 16                                 # attention_size=16
    key = jax.random.PRNGKey(0)
    kx, k1, k2 = jax.random.split(key, 3)

    x = jax.random.normal(kx, (B, S, E), jnp.float32)
    bound1 = 1.0 / math.sqrt(E)
    w1 = jax.random.uniform(k1, (E, A), jnp.float32, -bound1, bound1)
    bound2 = 1.0 / math.sqrt(A)
    w2 = jax.random.uniform(k2, (A, 1), jnp.float32, -bound2, bound2)

    # f32 path
    out = self_attention_pooling(x, w1, w2)
    jax.block_until_ready(out)
    assert out.shape == (B, E), out.shape
    ref = reference_forward(x, w1, w2)
    err = float(jnp.max(jnp.abs(out - ref)))
    assert err < 2e-3, (err, out, ref)

    # bf16 storage path (halved HBM bytes); softmax/pooling still accumulate f32
    xb = x.astype(jnp.bfloat16)
    w1b = w1.astype(jnp.bfloat16)
    w2b = w2.astype(jnp.bfloat16)
    out_bf = self_attention_pooling(xb, w1b, w2b)
    jax.block_until_ready(out_bf)
    ref_bf = reference_forward(xb.astype(jnp.float32), w1b.astype(jnp.float32),
                               w2b.astype(jnp.float32))
    err_bf = float(jnp.max(jnp.abs(out_bf.astype(jnp.float32) - ref_bf)))
    assert err_bf < 5e-2, err_bf

    print("KERNEL_OK")
</pallas_src>

<mosaic_0001>
module attributes {stable_mosaic.version = 11 : i64} {
  func.func @sap_kernel(%arg0: i32, %arg1: memref<2x8x32xf32, #tpu.memory_space<vmem>>, %arg2: memref<32x16xf32, #tpu.memory_space<vmem>>, %arg3: memref<1x16xf32, #tpu.memory_space<vmem>>, %arg4: memref<2x32xf32, #tpu.memory_space<vmem>>) attributes {dimension_semantics = [#tpu.dimension_semantics<parallel>], iteration_bounds = array<i64: 1>, scalar_prefetch = 0 : i64, scratch_operands = 0 : i64, tpu.core_type = #tpu.core_type<tc>, window_params = [{transform_indices = @transform_0, window_bounds = array<i64: 2, 8, 32>}, {pipeline_mode = #tpu.pipeline_mode<synchronous>, transform_indices = @transform_1, window_bounds = array<i64: 32, 16>}, {pipeline_mode = #tpu.pipeline_mode<synchronous>, transform_indices = @transform_2, window_bounds = array<i64: 1, 16>}, {transform_indices = @transform_3, window_bounds = array<i64: 2, 32>}]} {
    %c0 = arith.constant 0 : index
    %c0_0 = arith.constant 0 : index
    %c0_1 = arith.constant 0 : index
    %0 = vector.load %arg1[%c0, %c0_0, %c0_1] : memref<2x8x32xf32, #tpu.memory_space<vmem>>, vector<2x8x32xf32>
    %1 = vector.shape_cast %0 : vector<2x8x32xf32> to vector<16x32xf32>
    %c0_2 = arith.constant 0 : index
    %c0_3 = arith.constant 0 : index
    %2 = vector.load %arg2[%c0_2, %c0_3] : memref<32x16xf32, #tpu.memory_space<vmem>>, vector<32x16xf32>
    %cst = arith.constant dense<0.000000e+00> : vector<16x16xf32>
    %3 = tpu.matmul %1, %2, %cst {dimension_numbers = #tpu.dot_dimension_numbers<[1], [0], [0], [1], [0, 0, 1, 1], [], []>} : vector<16x32xf32>, vector<32x16xf32>, vector<16x16xf32> -> vector<16x16xf32>
    %4 = math.tanh %3 : vector<16x16xf32>
    %c0_4 = arith.constant 0 : index
    %c0_5 = arith.constant 0 : index
    %5 = vector.load %arg3[%c0_4, %c0_5] : memref<1x16xf32, #tpu.memory_space<vmem>>, vector<1x16xf32>
    %6 = vector.broadcast %5 : vector<1x16xf32> to vector<16x16xf32>
    %7 = arith.mulf %4, %6 : vector<16x16xf32>
    %cst_6 = arith.constant dense<0.000000e+00> : vector<16xf32>
    %8 = vector.multi_reduction <add>, %7, %cst_6 [1] : vector<16x16xf32> to vector<16xf32>
    %9 = vector.shape_cast %8 : vector<16xf32> to vector<16x1xf32>
    %10 = vector.shape_cast %9 : vector<16x1xf32> to vector<2x8x1xf32>
    %cst_7 = arith.constant dense<0xFF800000> : vector<2x1xf32>
    %11 = vector.multi_reduction <maximumf>, %10, %cst_7 [1] : vector<2x8x1xf32> to vector<2x1xf32>
    %12 = vector.shape_cast %11 : vector<2x1xf32> to vector<2x1x1xf32>
    %13 = vector.broadcast %12 : vector<2x1x1xf32> to vector<2x8x1xf32>
    %14 = arith.subf %10, %13 : vector<2x8x1xf32>
    %15 = math.exp %14 : vector<2x8x1xf32>
    %cst_8 = arith.constant dense<0.000000e+00> : vector<2x1xf32>
    %16 = vector.multi_reduction <add>, %15, %cst_8 [1] : vector<2x8x1xf32> to vector<2x1xf32>
    %17 = vector.shape_cast %16 : vector<2x1xf32> to vector<2x1x1xf32>
    %18 = tpu.reciprocal %17 {approx = true} : vector<2x1x1xf32> -> vector<2x1x1xf32>
    %19 = vector.broadcast %18 : vector<2x1x1xf32> to vector<2x8x1xf32>
    %20 = arith.mulf %15, %19 : vector<2x8x1xf32>
    %21 = vector.broadcast %20 : vector<2x8x1xf32> to vector<2x8x32xf32>
    %22 = arith.mulf %0, %21 : vector<2x8x32xf32>
    %cst_9 = arith.constant dense<0.000000e+00> : vector<2x32xf32>
    %23 = vector.multi_reduction <add>, %22, %cst_9 [1] : vector<2x8x32xf32> to vector<2x32xf32>
    %c0_10 = arith.constant 0 : index
    %c0_11 = arith.constant 0 : index
    %24 = vector.load %arg4[%c0_10, %c0_11] : memref<2x32xf32, #tpu.memory_space<vmem>>, vector<2x32xf32>
    tpu.vector_store %arg4[%c0_10, %c0_11], %23 {strides = array<i32>} : memref<2x32xf32, #tpu.memory_space<vmem>>, vector<2x32xf32>,
    return
  }
  func.func @transform_0(%arg0: i32) -> (i32, i32, i32) {
    %c0_i32 = arith.constant 0 : i32
    %c0_i32_0 = arith.constant 0 : i32
    %c0_i32_1 = arith.constant 0 : i32
    return %arg0, %c0_i32, %c0_i32_0 : i32, i32, i32
  }
  func.func @transform_1(%arg0: i32) -> (i32, i32) {
    %c0_i32 = arith.constant 0 : i32
    %c0_i32_0 = arith.constant 0 : i32
    %c0_i32_1 = arith.constant 0 : i32
    return %c0_i32, %c0_i32_0 : i32, i32
  }
  func.func @transform_2(%arg0: i32) -> (i32, i32) {
    %c0_i32 = arith.constant 0 : i32
    %c0_i32_0 = arith.constant 0 : i32
    %c0_i32_1 = arith.constant 0 : i32
    return %c0_i32, %c0_i32_0 : i32, i32
  }
  func.func @transform_3(%arg0: i32) -> (i32, i32) {
    %c0_i32 = arith.constant 0 : i32
    %c0_i32_0 = arith.constant 0 : i32
    return %arg0, %c0_i32 : i32, i32
  }
}

</mosaic_0001>

<bundles_post_ra>
// kernel: tpu_custom_call.1
= control target key start
LH: loop header
LB: loop body
LE: loop exit
PB: predicated region body
PF: predicated region fallthrough
CT: control target
= control target key end

     0   :  { %vm21_vm0 = vcmask 261120   ;;  %s300_s0 = inlined_call_operand.vmem [shape: f32[2,8,32], index: 0, kind: input, shape index: {}]   ;;  %s301_s1 = inlined_call_operand.vmem [shape: f32[32,16], index: 1, kind: input, shape index: {}]   ;;  %s302_s2 = inlined_call_operand.vmem [shape: f32[1,16], index: 2, kind: input, shape index: {}]   ;;  %s303_s3 = inlined_call_operand.hbm [shape: f32[2,32], index: 3, kind: output, shape index: {}]  }
   0x1   :  { %v20_v0 = vld [vmem:[%s301_s1 + $0x18] sm:$0xff]  ;;  %v19_v1 = vld [vmem:[%s301_s1 + $0x10] sm:$0xff]  ;;  %v277_v2 = vld [vmem:[%s300_s0] sm:$0xff] }
   0x2   :  { %201 = vmatprep.subr.mxu0 %v20_v0  ;;  %v18_v3 = vld [vmem:[%s301_s1 + $0x8] sm:$0xff]  ;;  %209 = vmatprep.mubr.msk.f32.mxu0 %vm21_vm0, %v277_v2 }
   0x3   :  { %202 = vmatpush3.msra.mxu0 %v20_v0 }
   0x4   :  { %8 = vsyncpa [#allocation3], 0  ;;  %203 = vmatprep.subr.mxu0 %v19_v1  ;;  %v17_v4 = vld [vmem:[%s301_s1] sm:$0xff]  ;;  %v16_v5 = vld [vmem:[%s300_s0 + $0x8] sm:$0xff]  ;;  %vm114_vm1 = vcmask 130048   ;;  %s247_s0 = smov [#allocation2]  }
   0x5   :  { %204 = vmatpush3.msra.mxu0 %v19_v1  ;;  %v194_v10 = vld [vmem:[%s302_s2] ss:$0 sm:$0xff]  ;;  %s184_s1 = sshll.u32 %s247_s0, 4  ;;  %vm173_vm2 = vcmask 1041409   ;;  %vm176_vm3 = vcmask 254976   ;;  %s185_s1 = int_to_ptr.vmem [resolvable:$true] %s184_s1 }
   0x6   :  { %205 = vmatprep.subr.mxu0 %v18_v3  ;;  %s225_s2 = scalar_lea.vmem %s185_s1, 32  ;;  %p230_p1 = scmp.lt.s32.totalorder %s185_s1, %s185_s1 }
   0x7   :  { %206 = vmatpush3.msra.mxu0 %v18_v3  ;;  %p226_p0 = scmp.ne.s32.totalorder %s185_s1, %s225_s2  ;;  %p231_p2 = scmp.lt.s32.totalorder %s225_s2, %s225_s2 }
   0x8   :  { %207 = vmatprep.subr.mxu0 %v17_v4 }
   0x9   :  { %208 = vmatpush3.msra.mxu0 %v17_v4  ;;  %p232_p3 = por %p231_p2, %p230_p1 }
   0xa   :  { %210 = vmatmul.mubr.msk.f32.vlgmr.msra.gmra.mxu0 %vm21_vm0, %v16_v5 }
   0xb   :  { %p233_p4 = pnand %p232_p3, %p226_p0 }
  0xca   :  { %v211_v6 = vpop.f32.mrf.mxu0 }
  0xcb   :  { %213 = vtanh.f32 %v211_v6 }
  0xcc   :  { %v94_v7 = vpop.f32.mrf.mxu0 }
  0xcd   :  { %215 = vtanh.f32 %v94_v7 }
  0xd8   :  { %v214_v8 = vpop.eup %213 }
  0xd9   :  { %v113_v13 = vmul.f32 %v214_v8, %v194_v10 }
  0xda   :  { %v216_v9 = vpop.eup %215 }
  0xdb   :  { %v112_v11 = vmul.f32 %v216_v9, %v194_v10  ;;  %v118_v14 = vsel %vm114_vm1, %v113_v13, 0.0 }
  0xdd   :  { %v115_v12 = vsel %vm114_vm1, %v112_v11, 0.0 }
  0xde   :  { %116 = vadd.xlane.f32.xlu0 %v115_v12 }
  0xe2   :  { %119 = vadd.xlane.f32.xlu0 %v118_v14 }
 0x167   :  { %v117_v15 = vpop.xlane.xlu0 %116 }
 0x168   :  { %v121_v16 = vrot.slane %v117_v15, 4 }
 0x16a   :  { %v122_v17 = vmax.f32 %v117_v15, %v121_v16 }
 0x16b   :  { %v120_v18 = vpop.xlane.xlu0 %119 }
 0x16c   :  { %v123_v19 = vrot.slane %v122_v17, 2  ;;  %v127_v20 = vrot.slane %v120_v18, 4 }
 0x16e   :  { %v124_v21 = vmax.f32 %v122_v17, %v123_v19  ;;  %v128_v22 = vmax.f32 %v120_v18, %v127_v20 }
 0x170   :  { %v125_v23 = vrot.slane %v124_v21, 1  ;;  %v129_v24 = vrot.slane %v128_v22, 2 }
 0x172   :  { %v126_v25 = vmax.f32 %v124_v21, %v125_v23  ;;  %v130_v26 = vmax.f32 %v128_v22, %v129_v24 }
 0x174   :  { %v133_v27 = vsub.f32 %v117_v15, %v126_v25  ;;  %v131_v28 = vrot.slane %v130_v26, 1 }
 0x176   :  { %v135_v29 = vmul.f32 1.442695, %v133_v27  ;;  %v132_v30 = vmax.f32 %v130_v26, %v131_v28 }
 0x178   :  { %217 = vpow2.f32 %v135_v29  ;;  %v134_v31 = vsub.f32 %v120_v18, %v132_v30 }
 0x17a   :  { %v137_v32 = vmul.f32 1.442695, %v134_v31 }
 0x17c   :  { %219 = vpow2.f32 %v137_v32 }
 0x185   :  { %v218_v33 = vpop.eup %217 }
 0x186   :  { %v139_v34 = vrot.slane %v218_v33, 4 }
 0x188   :  { %v140_v35 = vadd.f32 %v218_v33, %v139_v34 }
 0x189   :  { %v220_v36 = vpop.eup %219 }
 0x18a   :  { %v145_v37 = vrot.slane %v220_v36, 4  ;;  %v141_v38 = vrot.slane %v140_v35, 2 }
 0x18c   :  { %v146_v39 = vadd.f32 %v220_v36, %v145_v37  ;;  %v142_v40 = vadd.f32 %v141_v38, %v140_v35 }
 0x18e   :  { %v143_v41 = vrot.slane %v142_v40, 1  ;;  %v147_v42 = vrot.slane %v146_v39, 2 }
 0x190   :  { %v144_v43 = vadd.f32 %v143_v41, %v142_v40  ;;  %v148_v44 = vadd.f32 %v147_v42, %v146_v39 }
 0x192   :  { %v149_v45 = vrot.slane %v148_v44, 1  ;;  %221 = vrcp.f32 %v144_v43 }
 0x194   :  { %v150_v46 = vadd.f32 %v149_v45, %v148_v44 }
 0x196   :  { %223 = vrcp.f32 %v150_v46 }
 0x19f   :  { %v222_v47 = vpop.eup %221 }
 0x1a0   :  { %v153_v48 = vmul.f32 %v222_v47, %v218_v33 }
 0x1a2   :  { %v155_v49 = vmul.f32 %v153_v48, %v277_v2 }
 0x1a3   :  { %v224_v50 = vpop.eup %223 }
 0x1a4   :  { %v154_v51 = vmul.f32 %v224_v50, %v220_v36  ;;  %v157_v52 = vsel %vm21_vm0, %v155_v49, 0.0 }
 0x1a5   :  { %v158_v53 = vrot.slane %v157_v52, 4 }
 0x1a6   :  { %v156_v54 = vmul.f32 %v154_v51, %v16_v5 }
 0x1a7   :  { %v159_v55 = vadd.f32 %v158_v53, %v157_v52 }
 0x1a8   :  { %v164_v56 = vsel %vm21_vm0, %v156_v54, 0.0 }
 0x1a9   :  { %v160_v57 = vrot.slane %v159_v55, 2  ;;  %v165_v58 = vrot.slane %v164_v56, 4 }
 0x1ab   :  { %v161_v59 = vadd.f32 %v160_v57, %v159_v55  ;;  %v166_v60 = vadd.f32 %v165_v58, %v164_v56 }
 0x1ad   :  { %v167_v61 = vrot.slane %v166_v60, 2  ;;  %v162_v62 = vrot.slane %v161_v59, 1 }
 0x1af   :  { %v168_v63 = vadd.f32 %v167_v61, %v166_v60  ;;  %v163_v1 = vadd.f32 %v162_v62, %v161_v59 }
 0x1b1   :  { %v169_v0 = vrot.slane %v168_v63, 1 }
 0x1b3   :  { %v170_v2 = vadd.f32 %v169_v0, %v168_v63 }
 0x1b5   :  { %v174_v3 = vsel %vm173_vm2, %v170_v2, %v163_v1 }
 0x1b6   :  { %177 = vst.msk [vmem:[#allocation2] sm:$0x3] %vm176_vm3, %v174_v3 }
 0x1b7   :  { %236 = shalt.err (!%p233_p4)
}
 0x1b8   :  { %187 = dma.vmem_to_hbm [thread:$0]  %s185_s1, 32, %s303_s3, [#allocation3]  }
 0x1b9   :  { %245 = dma.done.wait [#allocation3], 32  }
 0x1ba   :  { %246 = vsyncadd [#allocation3], 4294967264 }
 0x1bb   :  { %191 = vsyncpa [#allocation3], 1 }

</bundles_post_ra>
